<compile_context>
chip_gen: v6e
topology: v6e:2x2x1
jax: 0.10.0
libtpu: 0.0.40
codegen_flags: <defaults>
</compile_context>

<pallas_src>
import functools

import jax
import jax.numpy as jnp
import numpy as np
from jax.experimental import pallas as pl
from jax.experimental.pallas import tpu as pltpu


def _round_up(x, m):
    return ((x + m - 1) // m) * m


# ---------------------------------------------------------------------------
# Pallas kernel: one (blk, HW) row-block per grid step.
# ---------------------------------------------------------------------------
def _selfnorm_kernel(hw, is_two, x_ref, p_ref, out_ref):
    x = x_ref[...].astype(jnp.float32)               # (blk, HW)
    p = p_ref[...]                                   # (blk, 3 | 6) float32

    inv_hw = jnp.float32(1.0 / hw)
    inv_hw_m1 = jnp.float32(1.0 / (hw - 1))          # unbiased (HW > 1 asserted)

    # Two-pass statistics (matches torch mean / unbiased var numerics).
    mean = jnp.sum(x, axis=-1, keepdims=True) * inv_hw            # (blk, 1)
    d = x - mean
    var = jnp.sum(d * d, axis=-1, keepdims=True) * inv_hw_m1 + 1e-12
    std = jnp.sqrt(var)                                           # (blk, 1)

    # Folded grouped-Conv1d(k=2) + inference BatchNorm1d + sigmoid gate.
    g = jax.nn.sigmoid(p[:, 0:1] * mean + p[:, 1:2] * std + p[:, 2:3])
    if is_two:
        f = jax.nn.sigmoid(p[:, 3:4] * mean + p[:, 4:5] * std + p[:, 5:6])
        out = x * g + mean * (f - g)
    else:
        out = x * g

    out_ref[...] = out.astype(out_ref.dtype)


# ---------------------------------------------------------------------------
# Parameter folding: Conv1d(C, C, k=2, groups=C) + inference BatchNorm1d.
# ---------------------------------------------------------------------------
def _fold_params(conv_w, bn_params):
    """conv_w: (C, 1, 2); bn_params: (gamma, beta, running_mean, running_var, eps).

    Returns (C, 3) with gate = sigmoid(a*mean + b*std + c) per channel.
    """
    gamma, beta, running_mean, running_var, eps = bn_params
    scale = gamma * jax.lax.rsqrt(running_var + eps)
    a = conv_w[:, 0, 0] * scale
    b = conv_w[:, 0, 1] * scale
    c = beta - running_mean * scale
    return jnp.stack([a, b, c], axis=-1).astype(jnp.float32)      # (C, 3)


# ---------------------------------------------------------------------------
# Wrapper: tiling decisions + pallas_call plumbing.
# ---------------------------------------------------------------------------
def self_norm(x, g_w, g_bn, f_w=None, f_bn=None):
    """x: (N, C, H, W), f32 or bf16 (NCHW). Inference-mode BatchNorm fold."""
    N, C, H, W = x.shape
    HW = H * W
    assert HW > 1, "SelfNorm: H*W must be > 1 (torch unbiased var of 1 elem is NaN)"
    is_two = f_w is not None
    n_params = 6 if is_two else 3

    rows = N * C
    itemsize = jnp.dtype(x.dtype).itemsize

    # ---- block-size selection against an explicit VMEM working-set budget ----
    # Pipeline buffers (2 x in + 2 x out, I/O dtype) + allowance for three f32
    # full-tile body temporaries (upcast x, centered diff, pre-store result)
    # + double-buffered packed params (lane-padded to 128).
    per_row_bytes = 4 * HW * itemsize + 3 * HW * 4 + 2 * 128 * 4
    BUDGET = 36 * 1024 * 1024            # fits v7x's 64 MiB/TC with headroom
    MIN_STEPS = 8                        # pipeline overlap + v7x dual-TC split
    MIN_TILE_BYTES = 1 << 20             # >= ~1 MiB x-tile keeps HBM streaming

    blk_budget = max(8, (BUDGET // per_row_bytes) // 8 * 8)
    blk_steps = _round_up(max(1, pl.cdiv(rows, MIN_STEPS)), 8)
    min_blk = _round_up(max(1, pl.cdiv(MIN_TILE_BYTES, HW * itemsize)), 8)
    blk = min(blk_budget, max(blk_steps, min_blk))
    blk = max(8, min(blk, _round_up(rows, 8)))
    grid_steps = pl.cdiv(rows, blk)

    # ---- flatten (free reshapes, no pad / no slice) ----
    x_flat = x.reshape(rows, HW)

    # ---- fold + pack per-row parameters into one (rows, n_params) array ----
    p_c = _fold_params(g_w, g_bn)                                 # (C, 3)
    if is_two:
        p_c = jnp.concatenate([p_c, _fold_params(f_w, f_bn)], axis=-1)  # (C, 6)
    params = jnp.tile(p_c, (N, 1))                                # (N*C, n_params)

    x_spec = pl.BlockSpec((blk, HW), lambda i: (i, 0))
    p_spec = pl.BlockSpec((blk, n_params), lambda i: (i, 0))
    out_spec = pl.BlockSpec((blk, HW), lambda i: (i, 0))

    out_flat = pl.pallas_call(
        functools.partial(_selfnorm_kernel, HW, is_two),
        out_shape=jax.ShapeDtypeStruct((rows, HW), x.dtype),
        grid_spec=pltpu.PrefetchScalarGridSpec(
            num_scalar_prefetch=0,
            grid=(grid_steps,),
            in_specs=[x_spec, p_spec],
            out_specs=out_spec,
        ),
        compiler_params=pltpu.CompilerParams(
            dimension_semantics=("parallel",),
            vmem_limit_bytes=48 * 1024 * 1024,
        ),
    )(x_flat, params)

    return out_flat.reshape(N, C, H, W)


# ---------------------------------------------------------------------------
# Pure-JAX reference (mirrors the PyTorch forward) for verification.
# ---------------------------------------------------------------------------
def self_norm_ref(x, g_w, g_bn, f_w=None, f_bn=None):
    N, C, H, W = x.shape
    xr = x.reshape(N, C, -1)
    mean = xr.mean(axis=2)                                 # (N, C)
    var = xr.var(axis=2, ddof=1) + 1e-12                   # unbiased, like torch .var
    std = jnp.sqrt(var)

    def gate(w, bn):
        gamma, beta, rm, rv, eps = bn
        y = w[None, :, 0, 0] * mean + w[None, :, 0, 1] * std
        y = (y - rm) / jnp.sqrt(rv + eps) * gamma + beta
        return jax.nn.sigmoid(y)

    g_y = gate(g_w, g_bn)[:, :, None, None]
    if f_w is not None:
        f_y = gate(f_w, f_bn)[:, :, None, None]
        m = mean[:, :, None, None]
        return x * g_y + m * (f_y - g_y)
    return x * g_y


# ---------------------------------------------------------------------------
if __name__ == "__main__":
    key = jax.random.PRNGKey(0)
    k0, k1, k2, k3 = jax.random.split(key, 4)

    def make_params(k, C):
        kg, kf = jax.random.split(k)
        g_w = 0.5 * jax.random.normal(kg, (C, 1, 2), dtype=jnp.float32)
        f_w = 0.5 * jax.random.normal(kf, (C, 1, 2), dtype=jnp.float32)
        # BatchNorm1d in inference mode with freshly-initialized running stats.
        bn = (
            jnp.ones((C,), jnp.float32),    # gamma
            jnp.zeros((C,), jnp.float32),   # beta
            jnp.zeros((C,), jnp.float32),   # running_mean
            jnp.ones((C,), jnp.float32),    # running_var
            1e-5,                           # eps
        )
        return g_w, f_w, bn

    # --- main shapes: (2, 4, 16, 16), f32 ---
    N, C, H, W = 2, 4, 16, 16
    x = jax.random.normal(k0, (N, C, H, W), dtype=jnp.float32)
    g_w, f_w, bn = make_params(k1, C)

    out = jax.block_until_ready(self_norm(x, g_w, bn))
    np.testing.assert_allclose(np.asarray(out),
                               np.asarray(self_norm_ref(x, g_w, bn)),
                               rtol=1e-5, atol=1e-5)

    out2 = jax.block_until_ready(self_norm(x, g_w, bn, f_w, bn))
    np.testing.assert_allclose(np.asarray(out2),
                               np.asarray(self_norm_ref(x, g_w, bn, f_w, bn)),
                               rtol=1e-5, atol=1e-5)

    # --- ragged shapes: HW % 128 != 0 and rows % 8 != 0 (no pad / no slice) ---
    Nr, Cr, Hr, Wr = 3, 3, 5, 7
    xr = jax.random.normal(k2, (Nr, Cr, Hr, Wr), dtype=jnp.float32)
    g_w2, f_w2, bn2 = make_params(k3, Cr)
    out3 = jax.block_until_ready(self_norm(xr, g_w2, bn2, f_w2, bn2))
    np.testing.assert_allclose(np.asarray(out3),
                               np.asarray(self_norm_ref(xr, g_w2, bn2, f_w2, bn2)),
                               rtol=1e-5, atol=1e-5)

    # --- bf16 I/O path (halves HBM traffic; stats stay f32 in-kernel) ---
    xb = x.astype(jnp.bfloat16)
    out4 = jax.block_until_ready(self_norm(xb, g_w, bn))
    ref4 = self_norm_ref(xb.astype(jnp.float32), g_w, bn).astype(jnp.bfloat16)
    np.testing.assert_allclose(np.asarray(out4.astype(jnp.float32)),
                               np.asarray(ref4.astype(jnp.float32)),
                               rtol=2e-2, atol=2e-2)

    print("KERNEL_OK")
</pallas_src>

<mosaic_0001>
module attributes {stable_mosaic.version = 11 : i64} {
  func.func @_selfnorm_kernel(%arg0: i32, %arg1: memref<8x256xf32, #tpu.memory_space<vmem>>, %arg2: memref<8x3xf32, #tpu.memory_space<vmem>>, %arg3: memref<8x256xf32, #tpu.memory_space<vmem>>) attributes {dimension_semantics = [#tpu.dimension_semantics<parallel>], iteration_bounds = array<i64: 1>, scalar_prefetch = 0 : i64, scratch_operands = 0 : i64, tpu.core_type = #tpu.core_type<tc>, window_params = [{transform_indices = @transform_0, window_bounds = array<i64: 8, 256>}, {transform_indices = @transform_1, window_bounds = array<i64: 8, 3>}, {transform_indices = @transform_2, window_bounds = array<i64: 8, 256>}]} {
    %c0 = arith.constant 0 : index
    %c0_0 = arith.constant 0 : index
    %0 = vector.load %arg1[%c0, %c0_0] : memref<8x256xf32, #tpu.memory_space<vmem>>, vector<8x256xf32>
    %c0_1 = arith.constant 0 : index
    %c0_2 = arith.constant 0 : index
    %1 = vector.load %arg2[%c0_1, %c0_2] : memref<8x3xf32, #tpu.memory_space<vmem>>, vector<8x3xf32>
    %cst = arith.constant dense<0.000000e+00> : vector<8xf32>
    %2 = vector.multi_reduction <add>, %0, %cst [1] : vector<8x256xf32> to vector<8xf32>
    %3 = vector.shape_cast %2 : vector<8xf32> to vector<8x1xf32>
    %cst_3 = arith.constant 3.906250e-03 : f32
    %4 = vector.broadcast %cst_3 : f32 to vector<8x1xf32>
    %5 = arith.mulf %3, %4 : vector<8x1xf32>
    %6 = vector.broadcast %5 : vector<8x1xf32> to vector<8x256xf32>
    %7 = arith.subf %0, %6 : vector<8x256xf32>
    %8 = arith.mulf %7, %7 : vector<8x256xf32>
    %cst_4 = arith.constant dense<0.000000e+00> : vector<8xf32>
    %9 = vector.multi_reduction <add>, %8, %cst_4 [1] : vector<8x256xf32> to vector<8xf32>
    %10 = vector.shape_cast %9 : vector<8xf32> to vector<8x1xf32>
    %cst_5 = arith.constant 0.00392156886 : f32
    %11 = vector.broadcast %cst_5 : f32 to vector<8x1xf32>
    %12 = arith.mulf %10, %11 : vector<8x1xf32>
    %cst_6 = arith.constant 9.99999996E-13 : f32
    %13 = vector.broadcast %cst_6 : f32 to vector<8x1xf32>
    %14 = arith.addf %12, %13 : vector<8x1xf32>
    %15 = math.sqrt %14 : vector<8x1xf32>
    %16 = vector.extract_strided_slice %1 {offsets = [0, 0], sizes = [8, 1], strides = [1, 1]} : vector<8x3xf32> to vector<8x1xf32>
    %17 = arith.mulf %16, %5 : vector<8x1xf32>
    %18 = vector.extract_strided_slice %1 {offsets = [0, 1], sizes = [8, 1], strides = [1, 1]} : vector<8x3xf32> to vector<8x1xf32>
    %19 = arith.mulf %18, %15 : vector<8x1xf32>
    %20 = arith.addf %17, %19 : vector<8x1xf32>
    %21 = vector.extract_strided_slice %1 {offsets = [0, 2], sizes = [8, 1], strides = [1, 1]} : vector<8x3xf32> to vector<8x1xf32>
    %22 = arith.addf %20, %21 : vector<8x1xf32>
    %23 = arith.negf %22 : vector<8x1xf32>
    %24 = math.exp %23 : vector<8x1xf32>
    %cst_7 = arith.constant 1.000000e+00 : f32
    %25 = vector.broadcast %cst_7 : f32 to vector<8x1xf32>
    %26 = arith.addf %25, %24 : vector<8x1xf32>
    %27 = arith.divf %25, %26 : vector<8x1xf32>
    %28 = vector.broadcast %27 : vector<8x1xf32> to vector<8x256xf32>
    %29 = arith.mulf %0, %28 : vector<8x256xf32>
    %c0_8 = arith.constant 0 : index
    %c0_9 = arith.constant 0 : index
    %30 = vector.load %arg3[%c0_8, %c0_9] : memref<8x256xf32, #tpu.memory_space<vmem>>, vector<8x256xf32>
    tpu.vector_store %arg3[%c0_8, %c0_9], %29 {strides = array<i32>} : memref<8x256xf32, #tpu.memory_space<vmem>>, vector<8x256xf32>,
    return
  }
  func.func @transform_0(%arg0: i32) -> (i32, i32) {
    %c0_i32 = arith.constant 0 : i32
    %c0_i32_0 = arith.constant 0 : i32
    return %arg0, %c0_i32 : i32, i32
  }
  func.func @transform_1(%arg0: i32) -> (i32, i32) {
    %c0_i32 = arith.constant 0 : i32
    %c0_i32_0 = arith.constant 0 : i32
    return %arg0, %c0_i32 : i32, i32
  }
  func.func @transform_2(%arg0: i32) -> (i32, i32) {
    %c0_i32 = arith.constant 0 : i32
    %c0_i32_0 = arith.constant 0 : i32
    return %arg0, %c0_i32 : i32, i32
  }
}

</mosaic_0001>

<bundles_post_ra>
// kernel: tpu_custom_call.1
= control target key start
LH: loop header
LB: loop body
LE: loop exit
PB: predicated region body
PF: predicated region fallthrough
CT: control target
= control target key end

     0   :  { %7 = vsyncpa [#allocation3], 0  ;;  %s175_s0 = inlined_call_operand.hbm [shape: f32[8,256], index: 0, kind: input, shape index: {}]   ;;  %s176_s1 = inlined_call_operand.vmem [shape: f32[8,3], index: 1, kind: input, shape index: {}]   ;;  %s177_s2 = inlined_call_operand.hbm [shape: f32[8,256], index: 2, kind: output, shape index: {}]  }
   0x1   :  { %8 = vsyncpa [#allocation4], 0  ;;  %s146_s9 = smov [#allocation2]  }
   0x2   :  { %s15_s10 = sshll.u32 %s146_s9, 4  ;;  %s16_s10 = int_to_ptr.vmem [resolvable:$true] %s15_s10 }
   0x3   :  { %s110_s11 = scalar_lea.vmem %s16_s10, 256  ;;  %p115_p1 = scmp.lt.s32.totalorder %s16_s10, %s16_s10 }
   0x4   :  { %p111_p0 = scmp.ne.s32.totalorder %s16_s10, %s110_s11  ;;  %p116_p2 = scmp.lt.s32.totalorder %s110_s11, %s110_s11 }
   0x6   :  { %p117_p3 = por %p116_p2, %p115_p1 }
   0x8   :  { %p118_p4 = pnand %p117_p3, %p111_p0 }
   0xa   :  { %121 = shalt.err (!%p118_p4)
}
   0xb   :  { %18 = dma.hbm_to_vmem [thread:$0]  %s175_s0, 256, %s16_s10, [#allocation3]  }
   0xc   :  { %142 = dma.done.wait [#allocation3], 256  }
   0xd   :  { %143 = vsyncadd [#allocation3], 4294967040  ;;  %v24_v0 = vld [vmem:[#allocation2] sm:$0xff]  ;;  %v25_v1 = vld [vmem:[#allocation2 + $0x8] sm:$0xff]  ;;  %s147_s15 = smov 127   ;;  %s148_s16 = smov 126  }
   0xe   :  { %v27_v2 = vadd.f32 %v25_v1, %v24_v0  ;;  %v26_v17 = vld [vmem:[%s176_s1] sm:$0xff]  ;;  %v149_v20 = vmov 0   ;;  %s150_s1 = smov [#allocation5]  }
   0xf   :  { %95 = vset.pattern.permute.xlu0 %v149_v20  ;;  %s80_s17 = sshll.u32 %s150_s1, 4  ;;  %s81_s17 = int_to_ptr.vmem [resolvable:$true] %s80_s17 }
  0x10   :  { %28 = vadd.xlane.f32.xlu0 %v27_v2  ;;  %s122_s18 = scalar_lea.vmem %s81_s17, 256  ;;  %p127_p6 = scmp.lt.s32.totalorder %s81_s17, %s81_s17 }
  0x11   :  { %p123_p5 = scmp.ne.s32.totalorder %s81_s17, %s122_s18  ;;  %p128_p7 = scmp.lt.s32.totalorder %s122_s18, %s122_s18 }
  0x13   :  { %p129_p8 = por %p128_p7, %p127_p6 }
  0x15   :  { %p130_p9 = pnand %p129_p8, %p123_p5 }
  0x99   :  { %v29_v3 = vpop.xlane.xlu0 %28 }
  0x9a   :  { %v30_v4 = vmul.f32 0.00390625, %v29_v3 }
  0x9c   :  { %v31_v5 = vsub.f32 %v24_v0, %v30_v4  ;;  %v32_v6 = vsub.f32 %v25_v1, %v30_v4  ;;  %v47_v22 = vmul.f32 %v30_v4, %v26_v17 }
  0x9e   :  { %v33_v7 = vmul.f32 %v31_v5, %v31_v5  ;;  %v34_v8 = vmul.f32 %v32_v6, %v32_v6 }
  0xa0   :  { %v35_v9 = vadd.f32 %v34_v8, %v33_v7 }
  0xa2   :  { %36 = vadd.xlane.f32.xlu0 %v35_v9 }
 0x12b   :  { %v37_v10 = vpop.xlane.xlu0 %36 }
 0x12c   :  { %v38_v11 = vmul.f32 0.003921569, %v37_v10 }
 0x12e   :  { %v39_v12 = vadd.f32 1e-12, %v38_v11 }
 0x130   :  { %96 = vrsqrt.f32 %v39_v12  ;;  %vm42_vm0 = vcmp.eq.f32.partialorder %v39_v12, inf  ;;  %v45_v15 = vand.u32 2147483648, %v39_v12  ;;  %vm44_vm1 = vcmp.eq.f32.partialorder %v39_v12, 0.0 }
 0x13d   :  { %v97_v13 = vpop.eup %96 }
 0x13e   :  { %v41_v14 = vmul.f32 %v97_v13, %v39_v12 }
 0x140   :  { %v43_v16 = vsel %vm42_vm0, %v39_v12, %v41_v14 }
 0x141   :  { %v46_v18 = vsel %vm44_vm1, %v45_v15, %v43_v16 }
 0x142   :  { %v48_v19 = vmul.f32 %v46_v18, %v26_v17 }
 0x144   :  { %50 = vrot.lane.b32.xlu1 %v48_v19, %s147_s15 }
 0x148   :  { %55 = vrot.lane.b32.xlu1 %v26_v17, %s148_s16 }
 0x1b6   :  { %v51_v21 = vpop.permute.xlu1 %50 }
 0x1b7   :  { %v53_v23 = vadd.f32 %v51_v21, %v47_v22 }
 0x1ba   :  { %v56_v24 = vpop.permute.xlu1 %55 }
 0x1bb   :  { %v58_v25 = vadd.f32 %v56_v24, %v53_v23 }
 0x1bd   :  { %v89_v26 = vmul.f32 -1.442695, %v58_v25 }
 0x1bf   :  { %98 = vpow2.f32 %v89_v26 }
 0x1cc   :  { %v99_v27 = vpop.eup %98 }
 0x1cd   :  { %v62_v28 = vadd.f32 1.0, %v99_v27 }
 0x1cf   :  { %100 = vrcp.f32 %v62_v28 }
 0x1dc   :  { %v101_v29 = vpop.eup %100 }
 0x1dd   :  { %67 = vperm.xlu0 %95, %v101_v29  }
 0x258   :  { %v68_v30 = vpop.permute.xlu0 %67 }
 0x259   :  { %v70_v31 = vmul.f32 %v68_v30, %v24_v0  ;;  %v71_v32 = vmul.f32 %v68_v30, %v25_v1 }
 0x25b   :  { %72 = vst [vmem:[#allocation5] sm:$0xff] %v70_v31  ;;  %73 = vst [vmem:[#allocation5 + $0x8] sm:$0xff] %v71_v32 }
 0x25c   :  { %133 = shalt.err (!%p130_p9)
}
 0x25d   :  { %83 = dma.vmem_to_hbm [thread:$0]  %s81_s17, 256, %s177_s2, [#allocation4]  }
 0x25e   :  { %144 = dma.done.wait [#allocation4], 256  }
 0x25f   :  { %145 = vsyncadd [#allocation4], 4294967040 }
 0x260   :  { %87 = vsyncpa [#allocation3], 1 }
 0x261   :  { %88 = vsyncpa [#allocation4], 1 }

</bundles_post_ra>
